<compile_context>
chip_gen: v7x
topology: tpu7x:2x2x1
jax: 0.10.0
libtpu: 0.0.40
codegen_flags: <defaults>
</compile_context>

<pallas_src>
import functools

import jax
import jax.numpy as jnp
from jax import lax
from jax.experimental import pallas as pl
from jax.experimental.pallas import tpu as pltpu


def _lstm_kernel(x2d_ref, wih_ref, whh_ref, b_ref, out_ref, *,
                 seq_len, batch_pad, hidden):
    """Whole-sequence LSTM recurrence in a single kernel invocation.

    x2d_ref : (T*Bp, F)  time-major inputs; rows t*Bp:(t+1)*Bp belong to step t
    wih_ref : (F, 4H)    input->gates weights (transposed)
    whh_ref : (H, 4H)    hidden->gates weights (transposed)
    b_ref   : (1, 4H)    b_ih + b_hh
    out_ref : (Bp, T*H)  lane-dense output; columns t*H:(t+1)*H hold h_t
    Gate order matches PyTorch: [i, f, g, o].
    """
    H = hidden
    Bp = batch_pad

    # Hoisted, batched input projection (single MXU call), bias folded in once.
    gates_x = jnp.dot(x2d_ref[...], wih_ref[...],
                      preferred_element_type=jnp.float32) + b_ref[...]

    whh = whh_ref[...]                                    # (H, 4H) loop-invariant
    h = jnp.zeros((Bp, H), jnp.float32)
    c = jnp.zeros((Bp, H), jnp.float32)

    hs = []
    # T is small and static: full unroll -> static, sublane-aligned slices.
    for t in range(seq_len):
        gates = gates_x[t * Bp:(t + 1) * Bp, :] + jnp.dot(
            h, whh, preferred_element_type=jnp.float32)    # (Bp, 4H)
        i_g = jax.nn.sigmoid(gates[:, 0 * H:1 * H])
        f_g = jax.nn.sigmoid(gates[:, 1 * H:2 * H])
        g_g = jnp.tanh(gates[:, 2 * H:3 * H])
        o_g = jax.nn.sigmoid(gates[:, 3 * H:4 * H])
        c = f_g * c + i_g * g_g
        h = o_g * jnp.tanh(c)
        hs.append(h)

    # Single lane-dense (Bp, T*H) store -> one unmasked full-width writeback.
    out_ref[...] = jnp.concatenate(hs, axis=1).astype(out_ref.dtype)


def lstm_forward(x, w_ih, w_hh, b_ih, b_hh):
    """x: (B, T, F) batch_first. Returns output: (B, T, H) (all hidden states)."""
    B, T, F = x.shape
    H = w_hh.shape[1]
    assert w_ih.shape == (4 * H, F)
    assert w_hh.shape == (4 * H, H)

    # Pad batch to the 8-sublane width so vregs / MXU rows are fully used.
    B_pad = ((B + 7) // 8) * 8
    x_p = jnp.pad(x, ((0, B_pad - B), (0, 0), (0, 0))) if B_pad != B else x

    # Time-major, flattened to (T*B_pad, F) so the x-projection is one matmul.
    x2d = jnp.transpose(x_p, (1, 0, 2)).reshape(T * B_pad, F)
    wih_t = jnp.transpose(w_ih, (1, 0))            # (F, 4H)
    whh_t = jnp.transpose(w_hh, (1, 0))            # (H, 4H)
    bias = (b_ih + b_hh).reshape(1, 4 * H)         # (1, 4H)

    kernel = functools.partial(_lstm_kernel, seq_len=T, batch_pad=B_pad, hidden=H)

    vmem = pl.BlockSpec(memory_space=pltpu.MemorySpace.VMEM)
    out2d = pl.pallas_call(
        kernel,
        out_shape=jax.ShapeDtypeStruct((B_pad, T * H), x.dtype),
        in_specs=[vmem, vmem, vmem, vmem],
        out_specs=vmem,
    )(x2d, wih_t, whh_t, bias)

    # (B_pad, T*H) -> (B_pad, T, H) -> drop padded batch rows.
    return out2d.reshape(B_pad, T, H)[:B]


def lstm_reference(x, w_ih, w_hh, b_ih, b_hh):
    """Pure-JAX reference matching torch.nn.LSTM(batch_first=True) semantics."""
    B, T, F = x.shape
    H = w_hh.shape[1]
    b = b_ih + b_hh

    def step(carry, x_t):
        h, c = carry
        gates = x_t @ w_ih.T + h @ w_hh.T + b
        i_g = jax.nn.sigmoid(gates[:, 0 * H:1 * H])
        f_g = jax.nn.sigmoid(gates[:, 1 * H:2 * H])
        g_g = jnp.tanh(gates[:, 2 * H:3 * H])
        o_g = jax.nn.sigmoid(gates[:, 3 * H:4 * H])
        c_new = f_g * c + i_g * g_g
        h_new = o_g * jnp.tanh(c_new)
        return (h_new, c_new), h_new

    h0 = jnp.zeros((B, H), x.dtype)
    c0 = jnp.zeros((B, H), x.dtype)
    (_, _), hs = lax.scan(step, (h0, c0), jnp.transpose(x, (1, 0, 2)))
    return jnp.transpose(hs, (1, 0, 2))


if __name__ == "__main__":
    # Net(feature_size=32, size_hidden=32), input (batch=2, seq=8, feature=32)
    feature_size = 32
    size_hidden = 32
    batch = 2
    seq = 8

    key = jax.random.PRNGKey(0)
    k_x, k_wih, k_whh, k_bih, k_bhh = jax.random.split(key, 5)

    # PyTorch-style init: U(-1/sqrt(H), 1/sqrt(H)), deterministic via PRNGKey(0)
    bound = 1.0 / (size_hidden ** 0.5)
    x = jax.random.normal(k_x, (batch, seq, feature_size), dtype=jnp.float32)
    w_ih = jax.random.uniform(k_wih, (4 * size_hidden, feature_size),
                              minval=-bound, maxval=bound, dtype=jnp.float32)
    w_hh = jax.random.uniform(k_whh, (4 * size_hidden, size_hidden),
                              minval=-bound, maxval=bound, dtype=jnp.float32)
    b_ih = jax.random.uniform(k_bih, (4 * size_hidden,),
                              minval=-bound, maxval=bound, dtype=jnp.float32)
    b_hh = jax.random.uniform(k_bhh, (4 * size_hidden,),
                              minval=-bound, maxval=bound, dtype=jnp.float32)

    out = lstm_forward(x, w_ih, w_hh, b_ih, b_hh)
    out = jax.block_until_ready(out)

    ref = jax.block_until_ready(lstm_reference(x, w_ih, w_hh, b_ih, b_hh))
    assert out.shape == (batch, seq, size_hidden)
    assert jnp.allclose(out, ref, atol=1e-5, rtol=1e-5)

    print("KERNEL_OK")
</pallas_src>

<mosaic_0001>
module attributes {stable_mosaic.version = 11 : i64} {
  func.func @_lstm_kernel(%arg0: memref<64x32xf32, #tpu.memory_space<vmem>>, %arg1: memref<32x128xf32, #tpu.memory_space<vmem>>, %arg2: memref<32x128xf32, #tpu.memory_space<vmem>>, %arg3: memref<1x128xf32, #tpu.memory_space<vmem>>, %arg4: memref<8x256xf32, #tpu.memory_space<vmem>>) attributes {dimension_semantics = [], scalar_prefetch = 0 : i64, scratch_operands = 0 : i64, tpu.core_type = #tpu.core_type<tc>} {
    %c0 = arith.constant 0 : index
    %c0_0 = arith.constant 0 : index
    %0 = vector.load %arg0[%c0, %c0_0] : memref<64x32xf32, #tpu.memory_space<vmem>>, vector<64x32xf32>
    %c0_1 = arith.constant 0 : index
    %c0_2 = arith.constant 0 : index
    %1 = vector.load %arg1[%c0_1, %c0_2] : memref<32x128xf32, #tpu.memory_space<vmem>>, vector<32x128xf32>
    %cst = arith.constant dense<0.000000e+00> : vector<64x128xf32>
    %2 = tpu.matmul %0, %1, %cst {dimension_numbers = #tpu.dot_dimension_numbers<[1], [0], [0], [1], [0, 0, 1, 1], [], []>} : vector<64x32xf32>, vector<32x128xf32>, vector<64x128xf32> -> vector<64x128xf32>
    %c0_3 = arith.constant 0 : index
    %c0_4 = arith.constant 0 : index
    %3 = vector.load %arg3[%c0_3, %c0_4] : memref<1x128xf32, #tpu.memory_space<vmem>>, vector<1x128xf32>
    %4 = vector.broadcast %3 : vector<1x128xf32> to vector<64x128xf32>
    %5 = arith.addf %2, %4 : vector<64x128xf32>
    %c0_5 = arith.constant 0 : index
    %c0_6 = arith.constant 0 : index
    %6 = vector.load %arg2[%c0_5, %c0_6] : memref<32x128xf32, #tpu.memory_space<vmem>>, vector<32x128xf32>
    %cst_7 = arith.constant 0.000000e+00 : f32
    %7 = vector.broadcast %cst_7 : f32 to vector<8x32xf32>
    %cst_8 = arith.constant 0.000000e+00 : f32
    %8 = vector.broadcast %cst_8 : f32 to vector<8x32xf32>
    %9 = vector.extract_strided_slice %5 {offsets = [0, 0], sizes = [8, 128], strides = [1, 1]} : vector<64x128xf32> to vector<8x128xf32>
    %cst_9 = arith.constant dense<0.000000e+00> : vector<8x128xf32>
    %10 = tpu.matmul %7, %6, %cst_9 {dimension_numbers = #tpu.dot_dimension_numbers<[1], [0], [0], [1], [0, 0, 1, 1], [], []>} : vector<8x32xf32>, vector<32x128xf32>, vector<8x128xf32> -> vector<8x128xf32>
    %11 = arith.addf %9, %10 : vector<8x128xf32>
    %12 = vector.extract_strided_slice %11 {offsets = [0, 0], sizes = [8, 32], strides = [1, 1]} : vector<8x128xf32> to vector<8x32xf32>
    %13 = arith.negf %12 : vector<8x32xf32>
    %14 = math.exp %13 : vector<8x32xf32>
    %cst_10 = arith.constant 1.000000e+00 : f32
    %15 = vector.broadcast %cst_10 : f32 to vector<8x32xf32>
    %16 = arith.addf %15, %14 : vector<8x32xf32>
    %17 = arith.divf %15, %16 : vector<8x32xf32>
    %18 = vector.extract_strided_slice %11 {offsets = [0, 32], sizes = [8, 32], strides = [1, 1]} : vector<8x128xf32> to vector<8x32xf32>
    %19 = arith.negf %18 : vector<8x32xf32>
    %20 = math.exp %19 : vector<8x32xf32>
    %cst_11 = arith.constant 1.000000e+00 : f32
    %21 = vector.broadcast %cst_11 : f32 to vector<8x32xf32>
    %22 = arith.addf %21, %20 : vector<8x32xf32>
    %23 = arith.divf %21, %22 : vector<8x32xf32>
    %24 = vector.extract_strided_slice %11 {offsets = [0, 64], sizes = [8, 32], strides = [1, 1]} : vector<8x128xf32> to vector<8x32xf32>
    %25 = math.tanh %24 : vector<8x32xf32>
    %26 = vector.extract_strided_slice %11 {offsets = [0, 96], sizes = [8, 32], strides = [1, 1]} : vector<8x128xf32> to vector<8x32xf32>
    %27 = arith.negf %26 : vector<8x32xf32>
    %28 = math.exp %27 : vector<8x32xf32>
    %cst_12 = arith.constant 1.000000e+00 : f32
    %29 = vector.broadcast %cst_12 : f32 to vector<8x32xf32>
    %30 = arith.addf %29, %28 : vector<8x32xf32>
    %31 = arith.divf %29, %30 : vector<8x32xf32>
    %32 = arith.mulf %23, %8 : vector<8x32xf32>
    %33 = arith.mulf %17, %25 : vector<8x32xf32>
    %34 = arith.addf %32, %33 : vector<8x32xf32>
    %35 = math.tanh %34 : vector<8x32xf32>
    %36 = arith.mulf %31, %35 : vector<8x32xf32>
    %37 = vector.extract_strided_slice %5 {offsets = [8, 0], sizes = [8, 128], strides = [1, 1]} : vector<64x128xf32> to vector<8x128xf32>
    %cst_13 = arith.constant dense<0.000000e+00> : vector<8x128xf32>
    %38 = tpu.matmul %36, %6, %cst_13 {dimension_numbers = #tpu.dot_dimension_numbers<[1], [0], [0], [1], [0, 0, 1, 1], [], []>} : vector<8x32xf32>, vector<32x128xf32>, vector<8x128xf32> -> vector<8x128xf32>
    %39 = arith.addf %37, %38 : vector<8x128xf32>
    %40 = vector.extract_strided_slice %39 {offsets = [0, 0], sizes = [8, 32], strides = [1, 1]} : vector<8x128xf32> to vector<8x32xf32>
    %41 = arith.negf %40 : vector<8x32xf32>
    %42 = math.exp %41 : vector<8x32xf32>
    %cst_14 = arith.constant 1.000000e+00 : f32
    %43 = vector.broadcast %cst_14 : f32 to vector<8x32xf32>
    %44 = arith.addf %43, %42 : vector<8x32xf32>
    %45 = arith.divf %43, %44 : vector<8x32xf32>
    %46 = vector.extract_strided_slice %39 {offsets = [0, 32], sizes = [8, 32], strides = [1, 1]} : vector<8x128xf32> to vector<8x32xf32>
    %47 = arith.negf %46 : vector<8x32xf32>
    %48 = math.exp %47 : vector<8x32xf32>
    %cst_15 = arith.constant 1.000000e+00 : f32
    %49 = vector.broadcast %cst_15 : f32 to vector<8x32xf32>
    %50 = arith.addf %49, %48 : vector<8x32xf32>
    %51 = arith.divf %49, %50 : vector<8x32xf32>
    %52 = vector.extract_strided_slice %39 {offsets = [0, 64], sizes = [8, 32], strides = [1, 1]} : vector<8x128xf32> to vector<8x32xf32>
    %53 = math.tanh %52 : vector<8x32xf32>
    %54 = vector.extract_strided_slice %39 {offsets = [0, 96], sizes = [8, 32], strides = [1, 1]} : vector<8x128xf32> to vector<8x32xf32>
    %55 = arith.negf %54 : vector<8x32xf32>
    %56 = math.exp %55 : vector<8x32xf32>
    %cst_16 = arith.constant 1.000000e+00 : f32
    %57 = vector.broadcast %cst_16 : f32 to vector<8x32xf32>
    %58 = arith.addf %57, %56 : vector<8x32xf32>
    %59 = arith.divf %57, %58 : vector<8x32xf32>
    %60 = arith.mulf %51, %34 : vector<8x32xf32>
    %61 = arith.mulf %45, %53 : vector<8x32xf32>
    %62 = arith.addf %60, %61 : vector<8x32xf32>
    %63 = math.tanh %62 : vector<8x32xf32>
    %64 = arith.mulf %59, %63 : vector<8x32xf32>
    %65 = vector.extract_strided_slice %5 {offsets = [16, 0], sizes = [8, 128], strides = [1, 1]} : vector<64x128xf32> to vector<8x128xf32>
    %cst_17 = arith.constant dense<0.000000e+00> : vector<8x128xf32>
    %66 = tpu.matmul %64, %6, %cst_17 {dimension_numbers = #tpu.dot_dimension_numbers<[1], [0], [0], [1], [0, 0, 1, 1], [], []>} : vector<8x32xf32>, vector<32x128xf32>, vector<8x128xf32> -> vector<8x128xf32>
    %67 = arith.addf %65, %66 : vector<8x128xf32>
    %68 = vector.extract_strided_slice %67 {offsets = [0, 0], sizes = [8, 32], strides = [1, 1]} : vector<8x128xf32> to vector<8x32xf32>
    %69 = arith.negf %68 : vector<8x32xf32>
    %70 = math.exp %69 : vector<8x32xf32>
    %cst_18 = arith.constant 1.000000e+00 : f32
    %71 = vector.broadcast %cst_18 : f32 to vector<8x32xf32>
    %72 = arith.addf %71, %70 : vector<8x32xf32>
    %73 = arith.divf %71, %72 : vector<8x32xf32>
    %74 = vector.extract_strided_slice %67 {offsets = [0, 32], sizes = [8, 32], strides = [1, 1]} : vector<8x128xf32> to vector<8x32xf32>
    %75 = arith.negf %74 : vector<8x32xf32>
    %76 = math.exp %75 : vector<8x32xf32>
    %cst_19 = arith.constant 1.000000e+00 : f32
    %77 = vector.broadcast %cst_19 : f32 to vector<8x32xf32>
    %78 = arith.addf %77, %76 : vector<8x32xf32>
    %79 = arith.divf %77, %78 : vector<8x32xf32>
    %80 = vector.extract_strided_slice %67 {offsets = [0, 64], sizes = [8, 32], strides = [1, 1]} : vector<8x128xf32> to vector<8x32xf32>
    %81 = math.tanh %80 : vector<8x32xf32>
    %82 = vector.extract_strided_slice %67 {offsets = [0, 96], sizes = [8, 32], strides = [1, 1]} : vector<8x128xf32> to vector<8x32xf32>
    %83 = arith.negf %82 : vector<8x32xf32>
    %84 = math.exp %83 : vector<8x32xf32>
    %cst_20 = arith.constant 1.000000e+00 : f32
    %85 = vector.broadcast %cst_20 : f32 to vector<8x32xf32>
    %86 = arith.addf %85, %84 : vector<8x32xf32>
    %87 = arith.divf %85, %86 : vector<8x32xf32>
    %88 = arith.mulf %79, %62 : vector<8x32xf32>
    %89 = arith.mulf %73, %81 : vector<8x32xf32>
    %90 = arith.addf %88, %89 : vector<8x32xf32>
    %91 = math.tanh %90 : vector<8x32xf32>
    %92 = arith.mulf %87, %91 : vector<8x32xf32>
    %93 = vector.extract_strided_slice %5 {offsets = [24, 0], sizes = [8, 128], strides = [1, 1]} : vector<64x128xf32> to vector<8x128xf32>
    %cst_21 = arith.constant dense<0.000000e+00> : vector<8x128xf32>
    %94 = tpu.matmul %92, %6, %cst_21 {dimension_numbers = #tpu.dot_dimension_numbers<[1], [0], [0], [1], [0, 0, 1, 1], [], []>} : vector<8x32xf32>, vector<32x128xf32>, vector<8x128xf32> -> vector<8x128xf32>
    %95 = arith.addf %93, %94 : vector<8x128xf32>
    %96 = vector.extract_strided_slice %95 {offsets = [0, 0], sizes = [8, 32], strides = [1, 1]} : vector<8x128xf32> to vector<8x32xf32>
    %97 = arith.negf %96 : vector<8x32xf32>
    %98 = math.exp %97 : vector<8x32xf32>
    %cst_22 = arith.constant 1.000000e+00 : f32
    %99 = vector.broadcast %cst_22 : f32 to vector<8x32xf32>
    %100 = arith.addf %99, %98 : vector<8x32xf32>
    %101 = arith.divf %99, %100 : vector<8x32xf32>
    %102 = vector.extract_strided_slice %95 {offsets = [0, 32], sizes = [8, 32], strides = [1, 1]} : vector<8x128xf32> to vector<8x32xf32>
    %103 = arith.negf %102 : vector<8x32xf32>
    %104 = math.exp %103 : vector<8x32xf32>
    %cst_23 = arith.constant 1.000000e+00 : f32
    %105 = vector.broadcast %cst_23 : f32 to vector<8x32xf32>
    %106 = arith.addf %105, %104 : vector<8x32xf32>
    %107 = arith.divf %105, %106 : vector<8x32xf32>
    %108 = vector.extract_strided_slice %95 {offsets = [0, 64], sizes = [8, 32], strides = [1, 1]} : vector<8x128xf32> to vector<8x32xf32>
    %109 = math.tanh %108 : vector<8x32xf32>
    %110 = vector.extract_strided_slice %95 {offsets = [0, 96], sizes = [8, 32], strides = [1, 1]} : vector<8x128xf32> to vector<8x32xf32>
    %111 = arith.negf %110 : vector<8x32xf32>
    %112 = math.exp %111 : vector<8x32xf32>
    %cst_24 = arith.constant 1.000000e+00 : f32
    %113 = vector.broadcast %cst_24 : f32 to vector<8x32xf32>
    %114 = arith.addf %113, %112 : vector<8x32xf32>
    %115 = arith.divf %113, %114 : vector<8x32xf32>
    %116 = arith.mulf %107, %90 : vector<8x32xf32>
    %117 = arith.mulf %101, %109 : vector<8x32xf32>
    %118 = arith.addf %116, %117 : vector<8x32xf32>
    %119 = math.tanh %118 : vector<8x32xf32>
    %120 = arith.mulf %115, %119 : vector<8x32xf32>
    %121 = vector.extract_strided_slice %5 {offsets = [32, 0], sizes = [8, 128], strides = [1, 1]} : vector<64x128xf32> to vector<8x128xf32>
    %cst_25 = arith.constant dense<0.000000e+00> : vector<8x128xf32>
    %122 = tpu.matmul %120, %6, %cst_25 {dimension_numbers = #tpu.dot_dimension_numbers<[1], [0], [0], [1], [0, 0, 1, 1], [], []>} : vector<8x32xf32>, vector<32x128xf32>, vector<8x128xf32> -> vector<8x128xf32>
    %123 = arith.addf %121, %122 : vector<8x128xf32>
    %124 = vector.extract_strided_slice %123 {offsets = [0, 0], sizes = [8, 32], strides = [1, 1]} : vector<8x128xf32> to vector<8x32xf32>
    %125 = arith.negf %124 : vector<8x32xf32>
    %126 = math.exp %125 : vector<8x32xf32>
    %cst_26 = arith.constant 1.000000e+00 : f32
    %127 = vector.broadcast %cst_26 : f32 to vector<8x32xf32>
    %128 = arith.addf %127, %126 : vector<8x32xf32>
    %129 = arith.divf %127, %128 : vector<8x32xf32>
    %130 = vector.extract_strided_slice %123 {offsets = [0, 32], sizes = [8, 32], strides = [1, 1]} : vector<8x128xf32> to vector<8x32xf32>
    %131 = arith.negf %130 : vector<8x32xf32>
    %132 = math.exp %131 : vector<8x32xf32>
    %cst_27 = arith.constant 1.000000e+00 : f32
    %133 = vector.broadcast %cst_27 : f32 to vector<8x32xf32>
    %134 = arith.addf %133, %132 : vector<8x32xf32>
    %135 = arith.divf %133, %134 : vector<8x32xf32>
    %136 = vector.extract_strided_slice %123 {offsets = [0, 64], sizes = [8, 32], strides = [1, 1]} : vector<8x128xf32> to vector<8x32xf32>
    %137 = math.tanh %136 : vector<8x32xf32>
    %138 = vector.extract_strided_slice %123 {offsets = [0, 96], sizes = [8, 32], strides = [1, 1]} : vector<8x128xf32> to vector<8x32xf32>
    %139 = arith.negf %138 : vector<8x32xf32>
    %140 = math.exp %139 : vector<8x32xf32>
    %cst_28 = arith.constant 1.000000e+00 : f32
    %141 = vector.broadcast %cst_28 : f32 to vector<8x32xf32>
    %142 = arith.addf %141, %140 : vector<8x32xf32>
    %143 = arith.divf %141, %142 : vector<8x32xf32>
    %144 = arith.mulf %135, %118 : vector<8x32xf32>
    %145 = arith.mulf %129, %137 : vector<8x32xf32>
    %146 = arith.addf %144, %145 : vector<8x32xf32>
    %147 = math.tanh %146 : vector<8x32xf32>
    %148 = arith.mulf %143, %147 : vector<8x32xf32>
    %149 = vector.extract_strided_slice %5 {offsets = [40, 0], sizes = [8, 128], strides = [1, 1]} : vector<64x128xf32> to vector<8x128xf32>
    %cst_29 = arith.constant dense<0.000000e+00> : vector<8x128xf32>
    %150 = tpu.matmul %148, %6, %cst_29 {dimension_numbers = #tpu.dot_dimension_numbers<[1], [0], [0], [1], [0, 0, 1, 1], [], []>} : vector<8x32xf32>, vector<32x128xf32>, vector<8x128xf32> -> vector<8x128xf32>
    %151 = arith.addf %149, %150 : vector<8x128xf32>
    %152 = vector.extract_strided_slice %151 {offsets = [0, 0], sizes = [8, 32], strides = [1, 1]} : vector<8x128xf32> to vector<8x32xf32>
    %153 = arith.negf %152 : vector<8x32xf32>
    %154 = math.exp %153 : vector<8x32xf32>
    %cst_30 = arith.constant 1.000000e+00 : f32
    %155 = vector.broadcast %cst_30 : f32 to vector<8x32xf32>
    %156 = arith.addf %155, %154 : vector<8x32xf32>
    %157 = arith.divf %155, %156 : vector<8x32xf32>
    %158 = vector.extract_strided_slice %151 {offsets = [0, 32], sizes = [8, 32], strides = [1, 1]} : vector<8x128xf32> to vector<8x32xf32>
    %159 = arith.negf %158 : vector<8x32xf32>
    %160 = math.exp %159 : vector<8x32xf32>
    %cst_31 = arith.constant 1.000000e+00 : f32
    %161 = vector.broadcast %cst_31 : f32 to vector<8x32xf32>
    %162 = arith.addf %161, %160 : vector<8x32xf32>
    %163 = arith.divf %161, %162 : vector<8x32xf32>
    %164 = vector.extract_strided_slice %151 {offsets = [0, 64], sizes = [8, 32], strides = [1, 1]} : vector<8x128xf32> to vector<8x32xf32>
    %165 = math.tanh %164 : vector<8x32xf32>
    %166 = vector.extract_strided_slice %151 {offsets = [0, 96], sizes = [8, 32], strides = [1, 1]} : vector<8x128xf32> to vector<8x32xf32>
    %167 = arith.negf %166 : vector<8x32xf32>
    %168 = math.exp %167 : vector<8x32xf32>
    %cst_32 = arith.constant 1.000000e+00 : f32
    %169 = vector.broadcast %cst_32 : f32 to vector<8x32xf32>
    %170 = arith.addf %169, %168 : vector<8x32xf32>
    %171 = arith.divf %169, %170 : vector<8x32xf32>
    %172 = arith.mulf %163, %146 : vector<8x32xf32>
    %173 = arith.mulf %157, %165 : vector<8x32xf32>
    %174 = arith.addf %172, %173 : vector<8x32xf32>
    %175 = math.tanh %174 : vector<8x32xf32>
    %176 = arith.mulf %171, %175 : vector<8x32xf32>
    %177 = vector.extract_strided_slice %5 {offsets = [48, 0], sizes = [8, 128], strides = [1, 1]} : vector<64x128xf32> to vector<8x128xf32>
    %cst_33 = arith.constant dense<0.000000e+00> : vector<8x128xf32>
    %178 = tpu.matmul %176, %6, %cst_33 {dimension_numbers = #tpu.dot_dimension_numbers<[1], [0], [0], [1], [0, 0, 1, 1], [], []>} : vector<8x32xf32>, vector<32x128xf32>, vector<8x128xf32> -> vector<8x128xf32>
    %179 = arith.addf %177, %178 : vector<8x128xf32>
    %180 = vector.extract_strided_slice %179 {offsets = [0, 0], sizes = [8, 32], strides = [1, 1]} : vector<8x128xf32> to vector<8x32xf32>
    %181 = arith.negf %180 : vector<8x32xf32>
    %182 = math.exp %181 : vector<8x32xf32>
    %cst_34 = arith.constant 1.000000e+00 : f32
    %183 = vector.broadcast %cst_34 : f32 to vector<8x32xf32>
    %184 = arith.addf %183, %182 : vector<8x32xf32>
    %185 = arith.divf %183, %184 : vector<8x32xf32>
    %186 = vector.extract_strided_slice %179 {offsets = [0, 32], sizes = [8, 32], strides = [1, 1]} : vector<8x128xf32> to vector<8x32xf32>
    %187 = arith.negf %186 : vector<8x32xf32>
    %188 = math.exp %187 : vector<8x32xf32>
    %cst_35 = arith.constant 1.000000e+00 : f32
    %189 = vector.broadcast %cst_35 : f32 to vector<8x32xf32>
    %190 = arith.addf %189, %188 : vector<8x32xf32>
    %191 = arith.divf %189, %190 : vector<8x32xf32>
    %192 = vector.extract_strided_slice %179 {offsets = [0, 64], sizes = [8, 32], strides = [1, 1]} : vector<8x128xf32> to vector<8x32xf32>
    %193 = math.tanh %192 : vector<8x32xf32>
    %194 = vector.extract_strided_slice %179 {offsets = [0, 96], sizes = [8, 32], strides = [1, 1]} : vector<8x128xf32> to vector<8x32xf32>
    %195 = arith.negf %194 : vector<8x32xf32>
    %196 = math.exp %195 : vector<8x32xf32>
    %cst_36 = arith.constant 1.000000e+00 : f32
    %197 = vector.broadcast %cst_36 : f32 to vector<8x32xf32>
    %198 = arith.addf %197, %196 : vector<8x32xf32>
    %199 = arith.divf %197, %198 : vector<8x32xf32>
    %200 = arith.mulf %191, %174 : vector<8x32xf32>
    %201 = arith.mulf %185, %193 : vector<8x32xf32>
    %202 = arith.addf %200, %201 : vector<8x32xf32>
    %203 = math.tanh %202 : vector<8x32xf32>
    %204 = arith.mulf %199, %203 : vector<8x32xf32>
    %205 = vector.extract_strided_slice %5 {offsets = [56, 0], sizes = [8, 128], strides = [1, 1]} : vector<64x128xf32> to vector<8x128xf32>
    %cst_37 = arith.constant dense<0.000000e+00> : vector<8x128xf32>
    %206 = tpu.matmul %204, %6, %cst_37 {dimension_numbers = #tpu.dot_dimension_numbers<[1], [0], [0], [1], [0, 0, 1, 1], [], []>} : vector<8x32xf32>, vector<32x128xf32>, vector<8x128xf32> -> vector<8x128xf32>
    %207 = arith.addf %205, %206 : vector<8x128xf32>
    %208 = vector.extract_strided_slice %207 {offsets = [0, 0], sizes = [8, 32], strides = [1, 1]} : vector<8x128xf32> to vector<8x32xf32>
    %209 = arith.negf %208 : vector<8x32xf32>
    %210 = math.exp %209 : vector<8x32xf32>
    %cst_38 = arith.constant 1.000000e+00 : f32
    %211 = vector.broadcast %cst_38 : f32 to vector<8x32xf32>
    %212 = arith.addf %211, %210 : vector<8x32xf32>
    %213 = arith.divf %211, %212 : vector<8x32xf32>
    %214 = vector.extract_strided_slice %207 {offsets = [0, 32], sizes = [8, 32], strides = [1, 1]} : vector<8x128xf32> to vector<8x32xf32>
    %215 = arith.negf %214 : vector<8x32xf32>
    %216 = math.exp %215 : vector<8x32xf32>
    %cst_39 = arith.constant 1.000000e+00 : f32
    %217 = vector.broadcast %cst_39 : f32 to vector<8x32xf32>
    %218 = arith.addf %217, %216 : vector<8x32xf32>
    %219 = arith.divf %217, %218 : vector<8x32xf32>
    %220 = vector.extract_strided_slice %207 {offsets = [0, 64], sizes = [8, 32], strides = [1, 1]} : vector<8x128xf32> to vector<8x32xf32>
    %221 = math.tanh %220 : vector<8x32xf32>
    %222 = vector.extract_strided_slice %207 {offsets = [0, 96], sizes = [8, 32], strides = [1, 1]} : vector<8x128xf32> to vector<8x32xf32>
    %223 = arith.negf %222 : vector<8x32xf32>
    %224 = math.exp %223 : vector<8x32xf32>
    %cst_40 = arith.constant 1.000000e+00 : f32
    %225 = vector.broadcast %cst_40 : f32 to vector<8x32xf32>
    %226 = arith.addf %225, %224 : vector<8x32xf32>
    %227 = arith.divf %225, %226 : vector<8x32xf32>
    %228 = arith.mulf %219, %202 : vector<8x32xf32>
    %229 = arith.mulf %213, %221 : vector<8x32xf32>
    %230 = arith.addf %228, %229 : vector<8x32xf32>
    %231 = math.tanh %230 : vector<8x32xf32>
    %232 = arith.mulf %227, %231 : vector<8x32xf32>
    %233 = tpu.concatenate %36, %64, %92, %120, %148, %176, %204, %232 in 1 : vector<8x32xf32>, vector<8x32xf32>, vector<8x32xf32>, vector<8x32xf32>, vector<8x32xf32>, vector<8x32xf32>, vector<8x32xf32>, vector<8x32xf32> -> vector<8x256xf32>
    %c0_41 = arith.constant 0 : index
    %c0_42 = arith.constant 0 : index
    %234 = vector.load %arg4[%c0_41, %c0_42] : memref<8x256xf32, #tpu.memory_space<vmem>>, vector<8x256xf32>
    tpu.vector_store %arg4[%c0_41, %c0_42], %233 {strides = array<i32>} : memref<8x256xf32, #tpu.memory_space<vmem>>, vector<8x256xf32>,
    return
  }
}

</mosaic_0001>

<bundles_post_ra>
// kernel: tpu_custom_call.1
= control target key start
LH: loop header
LB: loop body
LE: loop exit
PB: predicated region body
PF: predicated region fallthrough
CT: control target
= control target key end

     0   :  { %vm37_vm0 = vcmask 261120   ;;  %v1342_v4 = vmov 0.0|0.0   ;;  %vm1343_vm1 = vmmov 0   ;;  %v1344_v13 = vmov 0.0   ;;  %s1586_s0 = inlined_call_operand.vmem [shape: f32[64,32], index: 0, kind: input, shape index: {}]   ;;  %s1587_s1 = inlined_call_operand.vmem [shape: f32[32,128], index: 1, kind: input, shape index: {}]   ;;  %s1588_s2 = inlined_call_operand.vmem [shape: f32[32,128], index: 2, kind: input, shape index: {}]   ;;  %s1589_s3 = inlined_call_operand.vmem [shape: f32[1,128], index: 3, kind: input, shape index: {}]   ;;  %s1590_s4 = inlined_call_operand.hbm [shape: f32[8,256], index: 4, kind: output, shape index: {}]  }
   0x1   :  { %v26_v0 = vld [vmem:[%s1587_s1] sm:$0xff]  ;;  %v27_v1 = vld [vmem:[%s1587_s1 + $0x8] sm:$0xff]  ;;  %1199 = vmatprep.subr.bf16.mxu1 %v1342_v4  ;;  %v28_v6 = vld [vmem:[%s1587_s1 + $0x10] sm:$0xff]  ;;  %1111 = vmatprep.mubr.msk.f32.mxu1 %vm1343_vm1, %v1344_v13 }
   0x2   :  { %v167_v2 = vld [vmem:[%s1588_s2] sm:$0xff]  ;;  %v1191_v3 = vpack.c.bf16 %v27_v1, %v26_v0  ;;  %v168_v5 = vld [vmem:[%s1588_s2 + $0x8] sm:$0xff]  ;;  %v29_v7 = vld [vmem:[%s1587_s1 + $0x18] sm:$0xff] }
   0x3   :  { %v1393_v8 = vpack.c.bf16 %v168_v5, %v167_v2  ;;  %v1195_v9 = vpack.c.bf16 %v29_v7, %v28_v6  ;;  %v18_v10 = vld [vmem:[%s1586_s0] sm:$0xff]  ;;  %v169_v11 = vld [vmem:[%s1588_s2 + $0x10] sm:$0xff]  ;;  %v170_v12 = vld [vmem:[%s1588_s2 + $0x18] sm:$0xff] }
   0x4   :  { %1192 = vmatprep.subr.bf16.mxu0 %v1191_v3  ;;  %1091 = vmatprep.mubr.msk.f32.mxu0 %vm37_vm0, %v18_v10 }
   0x5   :  { %9 = vsyncpa [#allocation3], 0  ;;  %1194 = vmatpush3.bf16.msra.mxu0 %v1191_v3  ;;  %1201 = vmatpush3.bf16.msra.mxu1 %v1393_v8  ;;  %v1408_v14 = vpack.c.bf16 %v170_v12, %v169_v11  ;;  %v19_v15 = vld [vmem:[%s1586_s0 + $0x8] sm:$0xff]  ;;  %v1432_v16 = vld [vmem:[%s1589_s3] ss:$0 sm:$0xff]  ;;  %s1345_s9 = smov 64  }
   0x6   :  { %1196 = vmatprep.subr.bf16.mxu0 %v1195_v9  ;;  %1202 = vmatprep.subr.bf16.mxu1 %v1342_v4  ;;  %s1346_s3 = smov 32   ;;  %v20_v51 = vld [vmem:[%s1586_s0 + $0x10] sm:$0xff]  ;;  %v21_v52 = vld [vmem:[%s1586_s0 + $0x18] sm:$0xff]  ;;  %v22_v53 = vld [vmem:[%s1586_s0 + $0x20] sm:$0xff]  ;;  %vm984_vm2 = vcmask 523264   ;;  %vm986_vm3 = vcmask 785408  }
   0x7   :  { %v23_v54 = vld [vmem:[%s1586_s0 + $0x28] sm:$0xff]  ;;  %v24_v55 = vld [vmem:[%s1586_s0 + $0x30] sm:$0xff]  ;;  %v25_v56 = vld [vmem:[%s1586_s0 + $0x38] sm:$0xff]  ;;  %s1347_s0 = smov 96   ;;  %s1348_s22 = smov [#allocation2]  }
   0x8   :  { %s999_s23 = sshll.u32 %s1348_s22, 4  ;;  %s1000_s23 = int_to_ptr.vmem [resolvable:$true] %s999_s23 }
   0x9   :  { %1198 = vmatpush3.bf16.msra.mxu0 %v1195_v9  ;;  %1204 = vmatpush3.bf16.msra.mxu1 %v1408_v14  ;;  %s1318_s24 = scalar_lea.vmem %s1000_s23, 256  ;;  %p1323_p1 = scmp.lt.s32.totalorder %s1000_s23, %s1000_s23 }
   0xa   :  { %1205 = vmatprep.subr.bf16.mxu1 %v1342_v4  ;;  %1211 = vmatprep.subr.bf16.mxu0 %v1342_v4  ;;  %p1319_p0 = scmp.ne.s32.totalorder %s1000_s23, %s1318_s24  ;;  %p1324_p2 = scmp.lt.s32.totalorder %s1318_s24, %s1318_s24 }
   0xc   :  { %1092 = vmatmul.mubr.msk.f32.vlgmr.msra.gmra.mrb[0].mxu0 %vm37_vm0, %v19_v15  ;;  %1112 = vmatmul.mubr.f32.vlgmr.msra.gmra.mrb[0].mxu1 %v1344_v13  ;;  %p1325_p3 = por %p1324_p2, %p1323_p1 }
   0xd   :  { %1207 = vmatpush3.bf16.msra.mxu1 %v1393_v8  ;;  %1122 = vmatprep.mubr.msk.f32.mxu1 %vm1343_vm1, %v1344_v13 }
   0xe   :  { %1208 = vmatprep.subr.bf16.mxu1 %v1342_v4  ;;  %1213 = vmatpush3.bf16.msra.mxu0 %v1393_v8  ;;  %p1326_p4 = pnand %p1325_p3, %p1319_p0 }
   0xf   :  { %1214 = vmatprep.subr.bf16.mxu0 %v1342_v4  ;;  %1094 = vmatprep.mubr.msk.f32.mxu0 %vm37_vm0, %v20_v51 }
  0x10   :  { %1095 = vmatmul.mubr.msk.f32.gmra.mrb[2].mxu0 %vm37_vm0, %v21_v52 }
  0x11   :  { %1210 = vmatpush3.bf16.msra.mxu1 %v1408_v14  ;;  %1097 = vmatprep.mubr.msk.f32.mxu0 %vm37_vm0, %v22_v53 }
  0x12   :  { %1216 = vmatpush3.bf16.msra.mxu0 %v1408_v14  ;;  %1217 = vmatprep.subr.bf16.mxu1 %v1342_v4 }
  0x13   :  { %1223 = vmatprep.subr.bf16.mxu0 %v1342_v4 }
  0x14   :  { %1098 = vmatmul.mubr.msk.f32.gmra.mrb[4].mxu0 %vm37_vm0, %v23_v54 }
  0x15   :  { %1100 = vmatprep.mubr.msk.f32.mxu0 %vm37_vm0, %v24_v55 }
  0x18   :  { %1101 = vmatmul.mubr.msk.f32.gmra.mrb[6].mxu0 %vm37_vm0, %v25_v56 }
  0x19   :  { %1133 = vmatprep.mubr.msk.f32.mxu0 %vm1343_vm1, %v1344_v13 }
  0xdf   :  { %v1093_v17 = vpop.f32.mrb[0].mxu0  ;;  %v240_v18 = vpop.f32.mrb[0].mxu1 }
  0xe0   :  { %v128_v19 = vpop.f32.mrb[1].mxu0  ;;  %v1113_v20 = vpop.f32.mrb[1].mxu1  ;;  %v134_v37 = vadd.f32 %v1093_v17, %v1432_v16 }
  0xe1   :  { %v129_v21 = vadd.f32 %v1432_v16, %v128_v19 }
  0xe3   :  { %v244_v22 = vadd.f32 %v240_v18, %v129_v21  ;;  %v1096_v60 = vpop.f32.mrb[2].mxu0 }
  0xe4   :  { %v138_v61 = vpop.f32.mrb[3].mxu0 }
  0xe5   :  { %1254 = vtanh.f32 %v244_v22  ;;  %v1016_v24 = vmul.f32 -1.442695, %v244_v22  ;;  %v139_v3 = vadd.f32 %v1432_v16, %v138_v61 }
  0xe7   :  { %1256 = vpow2.f32 %v1016_v24  ;;  %v1483_v62 = vpop.f32.mrb[4].mxu0 }
  0xe8   :  { %v1485_v63 = vpop.f32.mrb[5].mxu0 }
  0xeb   :  { %v1487_v0 = vpop.f32.mrb[6].mxu0 }
  0xec   :  { %v1489_v1 = vpop.f32.mrb[7].mxu0 }
  0xef   :  { %v1255_v23 = vpop.eup %1254 }
  0xf0   :  { %254 = vrot.lane.b32.xlu0 %v1255_v23, %s1345_s9 }
  0xf1   :  { %v1257_v25 = vpop.eup %1256 }
  0xf2   :  { %v248_v26 = vadd.f32 1.0, %v1257_v25 }
  0xf4   :  { %1258 = vrcp.f32 %v248_v26  ;;  %v144_v26 = vadd.f32 %v1096_v60, %v1432_v16 }
  0xfe   :  { %v1259_v27 = vpop.eup %1258 }
  0xff   :  { %v252_v30 = vmul.f32 0.0, %v1259_v27 }
 0x162   :  { %v255_v28 = vpop.permute.xlu0 %254 }
 0x163   :  { %v257_v29 = vmul.f32 %v1259_v27, %v255_v28 }
 0x165   :  { %259 = vrot.lane.b32.xlu0 %v257_v29, %s1346_s3 }
 0x1d7   :  { %v260_v31 = vpop.permute.xlu0 %259 }
 0x1d8   :  { %v262_v32 = vadd.f32 %v260_v31, %v252_v30 }
 0x1da   :  { %1260 = vtanh.f32 %v262_v32 }
 0x1e4   :  { %v1261_v33 = vpop.eup %1260 }
 0x1e5   :  { %265 = vrot.lane.b32.xlu1 %v1261_v33, %s1345_s9 }
 0x257   :  { %v266_v34 = vpop.permute.xlu1 %265 }
 0x258   :  { %v268_v35 = vmul.f32 %v1259_v27, %v266_v34 }
 0x25a   :  { %270 = vrot.lane.b32.xlu1 %v268_v35, %s1346_s3 }
 0x2cc   :  { %v1439_v36 = vpop.permute.xlu1 %270 }
 0x2cd   :  { %1123 = vmatmul.mubr.msk.f32.vlgmr.msra.gmra.mrb[2].mxu1 %vm37_vm0, %v1439_v36 }
 0x2ce   :  { %1219 = vmatpush3.bf16.msra.mxu1 %v1393_v8  ;;  %1144 = vmatprep.mubr.msk.f32.mxu1 %vm1343_vm1, %v1344_v13 }
 0x2cf   :  { %1220 = vmatprep.subr.bf16.mxu1 %v1342_v4 }
 0x2d2   :  { %1222 = vmatpush3.bf16.msra.mxu1 %v1408_v14 }
 0x2d3   :  { %1229 = vmatprep.subr.bf16.mxu1 %v1342_v4 }
 0x3a0   :  { %v340_v38 = vpop.f32.mrb[2].mxu1 }
 0x3a1   :  { %v344_v39 = vadd.f32 %v340_v38, %v134_v37  ;;  %v1124_v40 = vpop.f32.mrb[3].mxu1 }
 0x3a3   :  { %1262 = vtanh.f32 %v344_v39  ;;  %v1018_v42 = vmul.f32 -1.442695, %v344_v39 }
 0x3a5   :  { %1264 = vpow2.f32 %v1018_v42 }
 0x3ad   :  { %v1263_v41 = vpop.eup %1262 }
 0x3ae   :  { %354 = vrot.lane.b32.xlu0 %v1263_v41, %s1345_s9 }
 0x3af   :  { %v1265_v43 = vpop.eup %1264 }
 0x3b0   :  { %v348_v44 = vadd.f32 1.0, %v1265_v43 }
 0x3b2   :  { %1266 = vrcp.f32 %v348_v44 }
 0x3bc   :  { %v1267_v45 = vpop.eup %1266 }
 0x3bd   :  { %v352_v48 = vmul.f32 %v1267_v45, %v262_v32 }
 0x420   :  { %v355_v46 = vpop.permute.xlu0 %354 }
 0x421   :  { %v357_v47 = vmul.f32 %v1267_v45, %v355_v46 }
 0x423   :  { %359 = vrot.lane.b32.xlu1 %v357_v47, %s1346_s3 }
 0x495   :  { %v360_v49 = vpop.permute.xlu1 %359 }
 0x496   :  { %v362_v50 = vadd.f32 %v360_v49, %v352_v48 }
 0x498   :  { %1268 = vtanh.f32 %v362_v50 }
 0x4a2   :  { %v1269_v57 = vpop.eup %1268 }
 0x4a3   :  { %365 = vrot.lane.b32.xlu0 %v1269_v57, %s1345_s9 }
 0x515   :  { %v366_v58 = vpop.permute.xlu0 %365 }
 0x516   :  { %v1479_v59 = vmul.f32 %v1267_v45, %v366_v58  ;;  %v149_v45 = vadd.f32 %v1432_v16, %v1485_v63 }
 0x518   :  { %370 = vrot.lane.b32.xlu1 %v1479_v59, %s1346_s3 }
 0x58a   :  { %v371_v2 = vpop.permute.xlu1 %370 }
 0x58b   :  { %1134 = vmatmul.mubr.msk.f32.vlgmr.msra.gmra.mrb[8].mxu0 %vm37_vm0, %v371_v2 }
 0x58c   :  { %1225 = vmatpush3.bf16.msra.mxu0 %v1393_v8  ;;  %1155 = vmatprep.mubr.msk.f32.mxu0 %vm1343_vm1, %v1344_v13 }
 0x58d   :  { %1226 = vmatprep.subr.bf16.mxu0 %v1342_v4 }
 0x590   :  { %1228 = vmatpush3.bf16.msra.mxu0 %v1408_v14 }
 0x591   :  { %1235 = vmatprep.subr.bf16.mxu0 %v1342_v4 }
 0x65e   :  { %v440_v5 = vpop.f32.mrb[8].mxu0 }
 0x65f   :  { %v444_v6 = vadd.f32 %v440_v5, %v139_v3  ;;  %v1135_v7 = vpop.f32.mrb[9].mxu0  ;;  %v154_v3 = vadd.f32 %v1483_v62, %v1432_v16 }
 0x661   :  { %1270 = vtanh.f32 %v444_v6  ;;  %v1020_v10 = vmul.f32 -1.442695, %v444_v6 }
 0x663   :  { %1272 = vpow2.f32 %v1020_v10 }
 0x66b   :  { %v1271_v9 = vpop.eup %1270 }
 0x66c   :  { %454 = vrot.lane.b32.xlu0 %v1271_v9, %s1345_s9 }
 0x66d   :  { %v1273_v11 = vpop.eup %1272 }
 0x66e   :  { %v448_v12 = vadd.f32 1.0, %v1273_v11 }
 0x670   :  { %1274 = vrcp.f32 %v448_v12 }
 0x67a   :  { %v1275_v15 = vpop.eup %1274 }
 0x67b   :  { %v452_v19 = vmul.f32 %v1275_v15, %v362_v50 }
 0x6de   :  { %v455_v17 = vpop.permute.xlu0 %454 }
 0x6df   :  { %v457_v18 = vmul.f32 %v1275_v15, %v455_v17 }
 0x6e1   :  { %459 = vrot.lane.b32.xlu1 %v457_v18, %s1346_s3 }
 0x753   :  { %v460_v20 = vpop.permute.xlu1 %459 }
 0x754   :  { %v462_v21 = vadd.f32 %v460_v20, %v452_v19 }
 0x756   :  { %1276 = vtanh.f32 %v462_v21 }
 0x760   :  { %v1277_v22 = vpop.eup %1276 }
 0x761   :  { %465 = vrot.lane.b32.xlu0 %v1277_v22, %s1345_s9 }
 0x7d3   :  { %v466_v23 = vpop.permute.xlu0 %465 }
 0x7d4   :  { %v1502_v24 = vmul.f32 %v1275_v15, %v466_v23 }
 0x7d6   :  { %470 = vrot.lane.b32.xlu1 %v1502_v24, %s1346_s3 }
 0x848   :  { %v471_v25 = vpop.permute.xlu1 %470 }
 0x849   :  { %1145 = vmatmul.mubr.msk.f32.vlgmr.msra.gmra.mrb[4].mxu1 %vm37_vm0, %v471_v25 }
 0x84a   :  { %1231 = vmatpush3.bf16.msra.mxu1 %v1393_v8  ;;  %1166 = vmatprep.mubr.msk.f32.mxu1 %vm1343_vm1, %v1344_v13 }
 0x84b   :  { %1232 = vmatprep.subr.bf16.mxu1 %v1342_v4 }
 0x84e   :  { %1234 = vmatpush3.bf16.msra.mxu1 %v1408_v14 }
 0x84f   :  { %1241 = vmatprep.subr.bf16.mxu1 %v1342_v4 }
 0x91c   :  { %v540_v27 = vpop.f32.mrb[4].mxu1 }
 0x91d   :  { %v544_v28 = vadd.f32 %v540_v27, %v144_v26  ;;  %v1146_v29 = vpop.f32.mrb[5].mxu1 }
 0x91f   :  { %1278 = vtanh.f32 %v544_v28  ;;  %v1022_v31 = vmul.f32 -1.442695, %v544_v28 }
 0x921   :  { %1280 = vpow2.f32 %v1022_v31 }
 0x929   :  { %v1279_v30 = vpop.eup %1278 }
 0x92a   :  { %554 = vrot.lane.b32.xlu0 %v1279_v30, %s1345_s9 }
 0x92b   :  { %v1281_v32 = vpop.eup %1280 }
 0x92c   :  { %v548_v33 = vadd.f32 1.0, %v1281_v32 }
 0x92e   :  { %1282 = vrcp.f32 %v548_v33 }
 0x938   :  { %v1283_v34 = vpop.eup %1282 }
 0x939   :  { %v552_v38 = vmul.f32 %v1283_v34, %v462_v21  ;;  %v159_v21 = vadd.f32 %v1432_v16, %v1489_v1 }
 0x99c   :  { %v555_v35 = vpop.permute.xlu0 %554 }
 0x99d   :  { %v557_v37 = vmul.f32 %v1283_v34, %v555_v35 }
 0x99f   :  { %559 = vrot.lane.b32.xlu1 %v557_v37, %s1346_s3 }
 0xa11   :  { %v560_v39 = vpop.permute.xlu1 %559 }
 0xa12   :  { %v562_v40 = vadd.f32 %v560_v39, %v552_v38 }
 0xa14   :  { %1284 = vtanh.f32 %v562_v40 }
 0xa1e   :  { %v1285_v41 = vpop.eup %1284 }
 0xa1f   :  { %565 = vrot.lane.b32.xlu0 %v1285_v41, %s1345_s9 }
 0xa91   :  { %v566_v42 = vpop.permute.xlu0 %565 }
 0xa92   :  { %v1517_v43 = vmul.f32 %v1283_v34, %v566_v42 }
 0xa94   :  { %570 = vrot.lane.b32.xlu1 %v1517_v43, %s1346_s3 }
 0xb06   :  { %v571_v44 = vpop.permute.xlu1 %570 }
 0xb07   :  { %1156 = vmatmul.mubr.msk.f32.vlgmr.msra.gmra.mrb[10].mxu0 %vm37_vm0, %v571_v44 }
 0xb08   :  { %1237 = vmatpush3.bf16.msra.mxu0 %v1393_v8  ;;  %1177 = vmatprep.mubr.msk.f32.mxu0 %vm1343_vm1, %v1344_v13 }
 0xb09   :  { %1238 = vmatprep.subr.bf16.mxu0 %v1342_v4 }
 0xb0c   :  { %1240 = vmatpush3.bf16.msra.mxu0 %v1408_v14 }
 0xbda   :  { %v640_v46 = vpop.f32.mrb[10].mxu0 }
 0xbdb   :  { %v644_v47 = vadd.f32 %v640_v46, %v149_v45  ;;  %v1157_v48 = vpop.f32.mrb[11].mxu0 }
 0xbdd   :  { %1286 = vtanh.f32 %v644_v47  ;;  %v1024_v50 = vmul.f32 -1.442695, %v644_v47 }
 0xbdf   :  { %1288 = vpow2.f32 %v1024_v50 }
 0xbe7   :  { %v1287_v49 = vpop.eup %1286 }
 0xbe8   :  { %654 = vrot.lane.b32.xlu0 %v1287_v49, %s1345_s9 }
 0xbe9   :  { %v1289_v51 = vpop.eup %1288 }
 0xbea   :  { %v648_v52 = vadd.f32 1.0, %v1289_v51 }
 0xbec   :  { %1290 = vrcp.f32 %v648_v52 }
 0xbf6   :  { %v1291_v53 = vpop.eup %1290 }
 0xbf7   :  { %v652_v56 = vmul.f32 %v1291_v53, %v562_v40  ;;  %v164_v40 = vadd.f32 %v1487_v0, %v1432_v16 }
 0xc5a   :  { %v655_v54 = vpop.permute.xlu0 %654 }
 0xc5b   :  { %v657_v55 = vmul.f32 %v1291_v53, %v655_v54 }
 0xc5d   :  { %659 = vrot.lane.b32.xlu1 %v657_v55, %s1346_s3 }
 0xccf   :  { %v660_v57 = vpop.permute.xlu1 %659 }
 0xcd0   :  { %v662_v58 = vadd.f32 %v660_v57, %v652_v56 }
 0xcd2   :  { %1292 = vtanh.f32 %v662_v58 }
 0xcdc   :  { %v1293_v60 = vpop.eup %1292 }
 0xcdd   :  { %665 = vrot.lane.b32.xlu0 %v1293_v60, %s1345_s9 }
 0xd4f   :  { %v666_v61 = vpop.permute.xlu0 %665 }
 0xd50   :  { %v668_v63 = vmul.f32 %v1291_v53, %v666_v61 }
 0xd52   :  { %670 = vrot.lane.b32.xlu1 %v668_v63, %s1346_s3 }
 0xdc4   :  { %v1533_v2 = vpop.permute.xlu1 %670 }
 0xdc5   :  { %1167 = vmatmul.mubr.msk.f32.vlgmr.msra.gmra.mrb[6].mxu1 %vm37_vm0, %v1533_v2 }
 0xdc6   :  { %1243 = vmatpush3.bf16.msra.mxu1 %v1393_v8  ;;  %1188 = vmatprep.mubr.msk.f32.mxu1 %vm1343_vm1, %v1344_v13 }
 0xdc7   :  { %1244 = vmatprep.subr.bf16.mxu1 %v1342_v4 }
 0xdca   :  { %1246 = vmatpush3.bf16.msra.mxu1 %v1408_v14 }
 0xe98   :  { %v740_v5 = vpop.f32.mrb[6].mxu1 }
 0xe99   :  { %v744_v6 = vadd.f32 %v740_v5, %v154_v3  ;;  %v1168_v7 = vpop.f32.mrb[7].mxu1 }
 0xe9b   :  { %1294 = vtanh.f32 %v744_v6  ;;  %v1026_v10 = vmul.f32 -1.442695, %v744_v6 }
 0xe9d   :  { %1296 = vpow2.f32 %v1026_v10 }
 0xea5   :  { %v1295_v9 = vpop.eup %1294 }
 0xea6   :  { %754 = vrot.lane.b32.xlu0 %v1295_v9, %s1345_s9 }
 0xea7   :  { %v1297_v8 = vpop.eup %1296 }
 0xea8   :  { %v748_v11 = vadd.f32 1.0, %v1297_v8 }
 0xeaa   :  { %1298 = vrcp.f32 %v748_v11 }
 0xeb4   :  { %v1299_v13 = vpop.eup %1298 }
 0xeb5   :  { %v752_v14 = vmul.f32 %v1299_v13, %v662_v58 }
 0xf18   :  { %v755_v12 = vpop.permute.xlu0 %754 }
 0xf19   :  { %v757_v4 = vmul.f32 %v1299_v13, %v755_v12 }
 0xf1b   :  { %759 = vrot.lane.b32.xlu1 %v757_v4, %s1346_s3 }
 0xf8d   :  { %v760_v15 = vpop.permute.xlu1 %759 }
 0xf8e   :  { %v762_v62 = vadd.f32 %v760_v15, %v752_v14 }
 0xf90   :  { %1300 = vtanh.f32 %v762_v62 }
 0xf9a   :  { %v1301_v17 = vpop.eup %1300 }
 0xf9b   :  { %765 = vrot.lane.b32.xlu0 %v1301_v17, %s1345_s9 }
0x100d   :  { %v766_v18 = vpop.permute.xlu0 %765 }
0x100e   :  { %v768_v19 = vmul.f32 %v1299_v13, %v766_v18 }
0x1010   :  { %770 = vrot.lane.b32.xlu1 %v768_v19, %s1346_s3 }
0x1082   :  { %v771_v20 = vpop.permute.xlu1 %770 }
0x1083   :  { %1178 = vmatmul.mubr.msk.f32.vlgmr.msra.gmra.mrb[12].mxu0 %vm37_vm0, %v771_v20 }
0x1156   :  { %v840_v22 = vpop.f32.mrb[12].mxu0 }
0x1157   :  { %v844_v23 = vadd.f32 %v840_v22, %v159_v21  ;;  %v1179_v25 = vpop.f32.mrb[13].mxu0 }
0x1159   :  { %1302 = vtanh.f32 %v844_v23  ;;  %v1028_v27 = vmul.f32 -1.442695, %v844_v23 }
0x115b   :  { %1304 = vpow2.f32 %v1028_v27 }
0x1163   :  { %v1303_v26 = vpop.eup %1302 }
0x1164   :  { %854 = vrot.lane.b32.xlu0 %v1303_v26, %s1345_s9 }
0x1165   :  { %v1305_v28 = vpop.eup %1304 }
0x1166   :  { %v848_v29 = vadd.f32 1.0, %v1305_v28 }
0x1168   :  { %1306 = vrcp.f32 %v848_v29 }
0x1172   :  { %v1307_v30 = vpop.eup %1306 }
0x1173   :  { %v852_v33 = vmul.f32 %v1307_v30, %v762_v62 }
0x11d6   :  { %v855_v31 = vpop.permute.xlu0 %854 }
0x11d7   :  { %v857_v32 = vmul.f32 %v1307_v30, %v855_v31 }
0x11d9   :  { %859 = vrot.lane.b32.xlu1 %v857_v32, %s1346_s3 }
0x124b   :  { %v860_v34 = vpop.permute.xlu1 %859 }
0x124c   :  { %v862_v1 = vadd.f32 %v860_v34, %v852_v33 }
0x124e   :  { %1308 = vtanh.f32 %v862_v1 }
0x1258   :  { %v1309_v35 = vpop.eup %1308 }
0x1259   :  { %865 = vrot.lane.b32.xlu0 %v1309_v35, %s1345_s9 }
0x12cb   :  { %v866_v37 = vpop.permute.xlu0 %865 }
0x12cc   :  { %v868_v38 = vmul.f32 %v1307_v30, %v866_v37 }
0x12ce   :  { %870 = vrot.lane.b32.xlu1 %v868_v38, %s1346_s3 }
0x1340   :  { %v871_v39 = vpop.permute.xlu1 %870 }
0x1341   :  { %1189 = vmatmul.mubr.msk.f32.vlgmr.msra.gmra.mrb[8].mxu1 %vm37_vm0, %v871_v39 }
0x1414   :  { %v940_v41 = vpop.f32.mrb[8].mxu1 }
0x1415   :  { %v944_v42 = vadd.f32 %v940_v41, %v164_v40  ;;  %v1190_v44 = vpop.f32.mrb[9].mxu1 }
0x1417   :  { %1310 = vtanh.f32 %v944_v42  ;;  %v1030_v46 = vmul.f32 -1.442695, %v944_v42 }
0x1419   :  { %1312 = vpow2.f32 %v1030_v46 }
0x1421   :  { %v1311_v45 = vpop.eup %1310 }
0x1422   :  { %954 = vrot.lane.b32.xlu0 %v1311_v45, %s1345_s9 }
0x1423   :  { %v1313_v47 = vpop.eup %1312 }
0x1424   :  { %v948_v48 = vadd.f32 1.0, %v1313_v47 }
0x1426   :  { %977 = vrot.lane.b32.xlu0 %v768_v19, %s1345_s9  ;;  %1314 = vrcp.f32 %v948_v48 }
0x1430   :  { %v1315_v49 = vpop.eup %1314 }
0x1431   :  { %v952_v16 = vmul.f32 %v1315_v49, %v862_v1 }
0x1494   :  { %v955_v50 = vpop.permute.xlu0 %954 }
0x1495   :  { %v957_v51 = vmul.f32 %v1315_v49, %v955_v50 }
0x1497   :  { %959 = vrot.lane.b32.xlu1 %v957_v51, %s1346_s3 }
0x149b   :  { %970 = vrot.lane.b32.xlu1 %v1479_v59, %s1345_s9 }
0x149f   :  { %973 = vrot.lane.b32.xlu1 %v1502_v24, %s1347_s0  ;;  %v978_v24 = vpop.permute.xlu0 %977 }
0x14a0   :  { %v988_v60 = vsel %vm37_vm0, %v1533_v2, %v978_v24 }
0x1509   :  { %v960_v0 = vpop.permute.xlu1 %959 }
0x150a   :  { %v962_v52 = vadd.f32 %v960_v0, %v952_v16 }
0x150c   :  { %1316 = vtanh.f32 %v962_v52 }
0x150d   :  { %v971_v53 = vpop.permute.xlu1 %970 }
0x150e   :  { %v983_v54 = vsel %vm37_vm0, %v1439_v36, %v971_v53 }
0x1511   :  { %v974_v55 = vpop.permute.xlu1 %973 }
0x1512   :  { %v985_v56 = vsel %vm984_vm2, %v983_v54, %v974_v55 }
0x1513   :  { %v987_v57 = vsel %vm986_vm3, %v985_v56, %v1517_v43 }
0x1514   :  { %991 = vst [vmem:[#allocation2] sm:$0xff] %v987_v57 }
0x1516   :  { %v1317_v59 = vpop.eup %1316 }
0x1517   :  { %965 = vrot.lane.b32.xlu0 %v1317_v59, %s1345_s9 }
0x151b   :  { %980 = vrot.lane.b32.xlu0 %v868_v38, %s1347_s0 }
0x1589   :  { %v966_v58 = vpop.permute.xlu0 %965 }
0x158a   :  { %v968_v61 = vmul.f32 %v1315_v49, %v966_v58 }
0x158d   :  { %v981_v36 = vpop.permute.xlu0 %980 }
0x158e   :  { %v989_v63 = vsel %vm984_vm2, %v988_v60, %v981_v36 }
0x158f   :  { %v990_v3 = vsel %vm986_vm3, %v989_v63, %v968_v61 }
0x1590   :  { %992 = vst [vmem:[#allocation2 + $0x8] sm:$0xff] %v990_v3 }
0x1591   :  { %1329 = shalt.err (!%p1326_p4)
}
0x1592   :  { %s1330_s27 = scalar_lea.hbm %s1590_s4, 256 }
0x1593   :  { %p1331_p5 = scmp.ne.s32.totalorder %s1590_s4, %s1330_s27  ;;  %p1334_p6 = scmp.lt.u32.totalorder %s1330_s27, %s1590_s4 }
0x1595   :  { %p1336_p7 = pnand %p1334_p6, %p1331_p5 }
0x1597   :  { %1339 = shalt.err (!%p1336_p7)
}
0x1598   :  { %1002 = dma.vmem_to_hbm [thread:$0]  %s1000_s23, 256, %s1590_s4, [#allocation3]  }
0x1599   :  { %1340 = dma.done.wait [#allocation3], 256  }
0x159a   :  { %1341 = vsyncadd [#allocation3], 4294967040 }
0x159b   :  { %1006 = vsyncpa [#allocation3], 1 }

</bundles_post_ra>
